<compile_context>
chip_gen: v6e
topology: v6e:2x2x1
jax: 0.10.0
libtpu: 0.0.40
codegen_flags: <defaults>
</compile_context>

<pallas_src>
import functools

import jax
import jax.numpy as jnp
from jax.experimental import pallas as pl
from jax.experimental.pallas import tpu as pltpu


def _round_up(x, m):
    return (x + m - 1) // m * m


# ----------------------------------------------------------------------------
# Fused kernel: pooled patch-embed matmul -> BatchNorm1d (batch stats)
#               -> bias-free Linear classifier, tiled over class blocks.
# ----------------------------------------------------------------------------
def _fused_kernel(pooled_ref, w_pe_ref, b_pe_ref, gamma_ref, beta_ref,
                  w_cls_ref, cls_ref, gf_ref, feat_ref, *, b_real):
    j = pl.program_id(0)

    @pl.when(j == 0)
    def _():
        # Backbone stand-in: (B, P) @ (P, D) on the MXU, bf16 operands,
        # f32 accumulation; bias added once on the pooled result.
        gf = jnp.dot(pooled_ref[...], w_pe_ref[...],
                     preferred_element_type=jnp.float32) + b_pe_ref[...]
        gf_ref[...] = gf

        # BatchNorm1d with per-call batch statistics (training mode).
        # Mask out zero-padded batch rows so they don't pollute mean/var.
        b_pad = gf.shape[0]
        rows = jax.lax.broadcasted_iota(jnp.int32, (b_pad, 1), 0)
        mask = rows < b_real
        inv_b = 1.0 / b_real
        mg = jnp.where(mask, gf, 0.0)
        mean = jnp.sum(mg, axis=0, keepdims=True) * inv_b
        d = jnp.where(mask, gf - mean, 0.0)
        var = jnp.sum(d * d, axis=0, keepdims=True) * inv_b
        inv_std = jax.lax.rsqrt(var + 1e-5)
        feat = (gf - mean) * inv_std * gamma_ref[...] + beta_ref[...]
        # Stored once as bf16: MXU operand reused by every classifier tile.
        feat_ref[...] = feat.astype(jnp.bfloat16)

    # Classifier tile: (B, D) @ (D, c_tile) -> lane-dense 128-multiple output.
    cls_ref[...] = jnp.dot(feat_ref[...], w_cls_ref[...],
                           preferred_element_type=jnp.float32)


# ----------------------------------------------------------------------------
# Host-side glue
# ----------------------------------------------------------------------------
def _pool_patches(x, patch):
    """Token-mean of non-overlapping (patch x patch) patch vectors, computed
    without materializing (B, N, P): mean over the patch-grid positions.
    Patch-vector layout is (C, ph, pw) row-major, matching w_pe."""
    B, C, H, W = x.shape
    hp, wp = H // patch, W // patch
    xr = x.reshape(B, C, hp, patch, wp, patch)
    pooled = xr.mean(axis=(2, 4))                  # (B, C, patch, patch) f32
    return pooled.reshape(B, C * patch * patch)    # (B, P)


def build_transformer_forward(x, params, patch, num_classes):
    """Training-mode forward: returns (cls_score, global_feat)."""
    B = x.shape[0]
    pooled = _pool_patches(x, patch)               # (B, P) f32
    P = pooled.shape[1]
    D = params["w_pe"].shape[1]

    b_pad = _round_up(B, 8)                        # sublane alignment
    p_pad = _round_up(P, 256)                      # 256-wide MXU contraction
    c_tile = min(512, _round_up(num_classes, 128))  # lane-dense class tiles
    c_pad = _round_up(num_classes, c_tile)

    # Pad + cast MXU operands to bf16 (halves DMA bytes, full-rate MXU).
    pooled_p = jnp.zeros((b_pad, p_pad), jnp.bfloat16).at[:B, :P].set(
        pooled.astype(jnp.bfloat16))
    w_pe_p = jnp.zeros((p_pad, D), jnp.bfloat16).at[:P, :].set(
        params["w_pe"].astype(jnp.bfloat16))
    w_cls_p = jnp.zeros((D, c_pad), jnp.bfloat16).at[:, :num_classes].set(
        params["w_cls"].astype(jnp.bfloat16))

    kernel = functools.partial(_fused_kernel, b_real=B)
    cls_pad, gf_pad = pl.pallas_call(
        kernel,
        out_shape=(jax.ShapeDtypeStruct((b_pad, c_pad), jnp.float32),
                   jax.ShapeDtypeStruct((b_pad, D), jnp.float32)),
        grid=(c_pad // c_tile,),
        in_specs=[
            pl.BlockSpec((b_pad, p_pad), lambda j: (0, 0)),   # pooled patches
            pl.BlockSpec((p_pad, D), lambda j: (0, 0)),       # w_pe
            pl.BlockSpec((1, D), lambda j: (0, 0)),           # b_pe
            pl.BlockSpec((1, D), lambda j: (0, 0)),           # bn gamma
            pl.BlockSpec((1, D), lambda j: (0, 0)),           # bn beta
            pl.BlockSpec((D, c_tile), lambda j: (0, j)),      # w_cls tile
        ],
        out_specs=(
            pl.BlockSpec((b_pad, c_tile), lambda j: (0, j)),  # cls tile
            pl.BlockSpec((b_pad, D), lambda j: (0, 0)),       # global_feat
        ),
        scratch_shapes=[pltpu.VMEM((b_pad, D), jnp.bfloat16)],
        compiler_params=pltpu.CompilerParams(
            # 'arbitrary': feat is computed once at j == 0 and carried in
            # VMEM scratch across the class-tile axis.
            # TODO(synk): for very large num_classes on v7x, recompute the
            # tiny BN per tile and mark this axis "parallel" to use both TCs.
            dimension_semantics=("arbitrary",)),
    )(pooled_p, w_pe_p, params["b_pe"], params["bn_gamma"],
      params["bn_beta"], w_cls_p)

    return cls_pad[:B, :num_classes], gf_pad[:B, :]


# ----------------------------------------------------------------------------
# Deterministic parameter init (mirrors the module's __init__ / init fns)
# ----------------------------------------------------------------------------
def init_params(key, in_chans, patch, in_planes, num_classes):
    k_pe, k_cls = jax.random.split(key)
    patch_dim = in_chans * patch * patch
    # patch-embed conv weight (kaiming fan_in scale), stored as (P, D) = W.T
    w_pe = jax.random.normal(k_pe, (patch_dim, in_planes), jnp.float32)
    w_pe = w_pe * jnp.sqrt(2.0 / patch_dim)
    b_pe = jnp.zeros((1, in_planes), jnp.float32)
    # bottleneck BatchNorm1d: weights_init_kaiming -> weight=1, bias=0
    bn_gamma = jnp.ones((1, in_planes), jnp.float32)
    bn_beta = jnp.zeros((1, in_planes), jnp.float32)
    # classifier Linear(in_planes, num_classes, bias=False),
    # weights_init_classifier -> normal(std=0.001); stored as (D, C) = W.T
    w_cls = 0.001 * jax.random.normal(k_cls, (in_planes, num_classes),
                                      jnp.float32)
    return dict(w_pe=w_pe, b_pe=b_pe, bn_gamma=bn_gamma, bn_beta=bn_beta,
                w_cls=w_cls)


# ----------------------------------------------------------------------------
# Pure-JAX references for correctness checks
# ----------------------------------------------------------------------------
def ref_forward(x, params, patch, num_classes):
    """Mirrors the kernel's numeric path (pool-first, bf16 MXU operands,
    f32 accumulation and f32 BN math) in pure JAX."""
    pooled = _pool_patches(x, patch).astype(jnp.bfloat16)
    gf = jnp.dot(pooled, params["w_pe"].astype(jnp.bfloat16),
                 preferred_element_type=jnp.float32) + params["b_pe"]
    mean = gf.mean(axis=0, keepdims=True)
    var = ((gf - mean) ** 2).mean(axis=0, keepdims=True)
    feat = (gf - mean) * jax.lax.rsqrt(var + 1e-5) * params["bn_gamma"] \
        + params["bn_beta"]
    cls = jnp.dot(feat.astype(jnp.bfloat16),
                  params["w_cls"].astype(jnp.bfloat16),
                  preferred_element_type=jnp.float32)
    return cls[:, :num_classes], gf


def ref_global_feat_original_order(x, params, patch):
    """f32, matmul-then-pool formulation (the un-hoisted backbone math)."""
    B, C, H, W = x.shape
    hp, wp = H // patch, W // patch
    xr = x.reshape(B, C, hp, patch, wp, patch).transpose(0, 2, 4, 1, 3, 5)
    patches = xr.reshape(B, hp * wp, C * patch * patch)
    tokens = jnp.einsum("bnp,pd->bnd", patches, params["w_pe"]) + params["b_pe"]
    return tokens.mean(axis=1)


if __name__ == "__main__":
    B, C, H, W = 2, 3, 16, 16          # small NCHW image input
    PATCH = 8                          # -> 4 tokens per image, P = 192
    IN_PLANES = 768                    # self.in_planes in the module
    NUM_CLASSES = 64

    key = jax.random.PRNGKey(0)
    k_x, k_p = jax.random.split(key)
    x = jax.random.normal(k_x, (B, C, H, W), jnp.float32)
    params = init_params(k_p, C, PATCH, IN_PLANES, NUM_CLASSES)

    cls_score, global_feat = build_transformer_forward(x, params, PATCH,
                                                       NUM_CLASSES)
    cls_score = jax.block_until_ready(cls_score)
    global_feat = jax.block_until_ready(global_feat)

    ref_cls, ref_gf = ref_forward(x, params, PATCH, NUM_CLASSES)
    assert cls_score.shape == (B, NUM_CLASSES)
    assert global_feat.shape == (B, IN_PLANES)
    assert jnp.allclose(global_feat, ref_gf, rtol=2e-3, atol=2e-3)
    assert jnp.allclose(cls_score, ref_cls, rtol=2e-3, atol=2e-3)

    # Sanity check: pooling-first + bf16 operands stay close to the original
    # matmul-then-pool f32 formulation of the (linear) stand-in backbone.
    gf_orig = ref_global_feat_original_order(x, params, PATCH)
    assert jnp.allclose(global_feat, gf_orig, rtol=5e-2, atol=5e-2)

    print("KERNEL_OK")
</pallas_src>

<mosaic_0001>
module attributes {stable_mosaic.version = 11 : i64} {
  func.func @_fused_kernel(%arg0: i32, %arg1: memref<8x256xbf16, #tpu.memory_space<vmem>>, %arg2: memref<256x768xbf16, #tpu.memory_space<vmem>>, %arg3: memref<1x768xf32, #tpu.memory_space<vmem>>, %arg4: memref<1x768xf32, #tpu.memory_space<vmem>>, %arg5: memref<1x768xf32, #tpu.memory_space<vmem>>, %arg6: memref<768x128xbf16, #tpu.memory_space<vmem>>, %arg7: memref<8x128xf32, #tpu.memory_space<vmem>>, %arg8: memref<8x768xf32, #tpu.memory_space<vmem>>, %arg9: memref<8x768xbf16, #tpu.memory_space<vmem>>) attributes {dimension_semantics = [#tpu.dimension_semantics<arbitrary>], iteration_bounds = array<i64: 1>, scalar_prefetch = 0 : i64, scratch_operands = 1 : i64, tpu.core_type = #tpu.core_type<tc>, window_params = [{pipeline_mode = #tpu.pipeline_mode<synchronous>, transform_indices = @transform_0, window_bounds = array<i64: 8, 256>}, {pipeline_mode = #tpu.pipeline_mode<synchronous>, transform_indices = @transform_1, window_bounds = array<i64: 256, 768>}, {pipeline_mode = #tpu.pipeline_mode<synchronous>, transform_indices = @transform_2, window_bounds = array<i64: 1, 768>}, {pipeline_mode = #tpu.pipeline_mode<synchronous>, transform_indices = @transform_3, window_bounds = array<i64: 1, 768>}, {pipeline_mode = #tpu.pipeline_mode<synchronous>, transform_indices = @transform_4, window_bounds = array<i64: 1, 768>}, {transform_indices = @transform_5, window_bounds = array<i64: 768, 128>}, {transform_indices = @transform_6, window_bounds = array<i64: 8, 128>}, {pipeline_mode = #tpu.pipeline_mode<synchronous>, transform_indices = @transform_7, window_bounds = array<i64: 8, 768>}]} {
    %c0_i32 = arith.constant 0 : i32
    %0 = arith.cmpi eq, %arg0, %c0_i32 : i32
    %1 = arith.extui %0 : i1 to i32
    %c0_i32_0 = arith.constant 0 : i32
    %2 = arith.cmpi ne, %1, %c0_i32_0 : i32
    scf.if %2 {
      %c0_6 = arith.constant 0 : index
      %c0_7 = arith.constant 0 : index
      %7 = vector.load %arg1[%c0_6, %c0_7] : memref<8x256xbf16, #tpu.memory_space<vmem>>, vector<8x256xbf16>
      %c0_8 = arith.constant 0 : index
      %c0_9 = arith.constant 0 : index
      %8 = vector.load %arg2[%c0_8, %c0_9] : memref<256x768xbf16, #tpu.memory_space<vmem>>, vector<256x768xbf16>
      %cst_10 = arith.constant dense<0.000000e+00> : vector<8x768xf32>
      %9 = tpu.matmul %7, %8, %cst_10 {dimension_numbers = #tpu.dot_dimension_numbers<[1], [0], [0], [1], [0, 0, 1, 1], [], []>} : vector<8x256xbf16>, vector<256x768xbf16>, vector<8x768xf32> -> vector<8x768xf32>
      %c0_11 = arith.constant 0 : index
      %c0_12 = arith.constant 0 : index
      %10 = vector.load %arg3[%c0_11, %c0_12] : memref<1x768xf32, #tpu.memory_space<vmem>>, vector<1x768xf32>
      %11 = vector.broadcast %10 : vector<1x768xf32> to vector<8x768xf32>
      %12 = arith.addf %9, %11 : vector<8x768xf32>
      %c0_13 = arith.constant 0 : index
      %c0_14 = arith.constant 0 : index
      %13 = vector.load %arg8[%c0_13, %c0_14] : memref<8x768xf32, #tpu.memory_space<vmem>>, vector<8x768xf32>
      tpu.vector_store %arg8[%c0_13, %c0_14], %12 {strides = array<i32>} : memref<8x768xf32, #tpu.memory_space<vmem>>, vector<8x768xf32>,
      %14 = tpu.iota {dimensions = array<i32: 0>} : vector<8x1xi32>
      %c2_i32 = arith.constant 2 : i32
      %15 = vector.broadcast %c2_i32 : i32 to vector<8x1xi32>
      %16 = arith.cmpi slt, %14, %15 : vector<8x1xi32>
      %cst_15 = arith.constant 0.000000e+00 : f32
      %17 = vector.shape_cast %16 : vector<8x1xi1> to vector<8x1xi1>
      %18 = vector.broadcast %17 : vector<8x1xi1> to vector<8x768xi1>
      %19 = vector.broadcast %cst_15 : f32 to vector<8x768xf32>
      %20 = arith.select %18, %12, %19 : vector<8x768xi1>, vector<8x768xf32>
      %cst_16 = arith.constant dense<0.000000e+00> : vector<768xf32>
      %21 = vector.multi_reduction <add>, %20, %cst_16 [0] : vector<8x768xf32> to vector<768xf32>
      %22 = vector.shape_cast %21 : vector<768xf32> to vector<1x768xf32>
      %cst_17 = arith.constant 5.000000e-01 : f32
      %23 = vector.broadcast %cst_17 : f32 to vector<1x768xf32>
      %24 = arith.mulf %22, %23 : vector<1x768xf32>
      %25 = vector.broadcast %24 : vector<1x768xf32> to vector<8x768xf32>
      %26 = arith.subf %12, %25 : vector<8x768xf32>
      %cst_18 = arith.constant 0.000000e+00 : f32
      %27 = vector.shape_cast %16 : vector<8x1xi1> to vector<8x1xi1>
      %28 = vector.broadcast %27 : vector<8x1xi1> to vector<8x768xi1>
      %29 = vector.broadcast %cst_18 : f32 to vector<8x768xf32>
      %30 = arith.select %28, %26, %29 : vector<8x768xi1>, vector<8x768xf32>
      %31 = arith.mulf %30, %30 : vector<8x768xf32>
      %cst_19 = arith.constant dense<0.000000e+00> : vector<768xf32>
      %32 = vector.multi_reduction <add>, %31, %cst_19 [0] : vector<8x768xf32> to vector<768xf32>
      %33 = vector.shape_cast %32 : vector<768xf32> to vector<1x768xf32>
      %cst_20 = arith.constant 5.000000e-01 : f32
      %34 = vector.broadcast %cst_20 : f32 to vector<1x768xf32>
      %35 = arith.mulf %33, %34 : vector<1x768xf32>
      %cst_21 = arith.constant 9.99999974E-6 : f32
      %36 = vector.broadcast %cst_21 : f32 to vector<1x768xf32>
      %37 = arith.addf %35, %36 : vector<1x768xf32>
      %38 = math.rsqrt %37 : vector<1x768xf32>
      %39 = vector.broadcast %24 : vector<1x768xf32> to vector<8x768xf32>
      %40 = arith.subf %12, %39 : vector<8x768xf32>
      %41 = vector.broadcast %38 : vector<1x768xf32> to vector<8x768xf32>
      %42 = arith.mulf %40, %41 : vector<8x768xf32>
      %c0_22 = arith.constant 0 : index
      %c0_23 = arith.constant 0 : index
      %43 = vector.load %arg4[%c0_22, %c0_23] : memref<1x768xf32, #tpu.memory_space<vmem>>, vector<1x768xf32>
      %44 = vector.broadcast %43 : vector<1x768xf32> to vector<8x768xf32>
      %45 = arith.mulf %42, %44 : vector<8x768xf32>
      %c0_24 = arith.constant 0 : index
      %c0_25 = arith.constant 0 : index
      %46 = vector.load %arg5[%c0_24, %c0_25] : memref<1x768xf32, #tpu.memory_space<vmem>>, vector<1x768xf32>
      %47 = vector.broadcast %46 : vector<1x768xf32> to vector<8x768xf32>
      %48 = arith.addf %45, %47 : vector<8x768xf32>
      %49 = arith.truncf %48 : vector<8x768xf32> to vector<8x768xbf16>
      %c0_26 = arith.constant 0 : index
      %c0_27 = arith.constant 0 : index
      %50 = vector.load %arg9[%c0_26, %c0_27] : memref<8x768xbf16, #tpu.memory_space<vmem>>, vector<8x768xbf16>
      tpu.vector_store %arg9[%c0_26, %c0_27], %49 {strides = array<i32>} : memref<8x768xbf16, #tpu.memory_space<vmem>>, vector<8x768xbf16>,
    } else {
    }
    %c0 = arith.constant 0 : index
    %c0_1 = arith.constant 0 : index
    %3 = vector.load %arg9[%c0, %c0_1] : memref<8x768xbf16, #tpu.memory_space<vmem>>, vector<8x768xbf16>
    %c0_2 = arith.constant 0 : index
    %c0_3 = arith.constant 0 : index
    %4 = vector.load %arg6[%c0_2, %c0_3] : memref<768x128xbf16, #tpu.memory_space<vmem>>, vector<768x128xbf16>
    %cst = arith.constant dense<0.000000e+00> : vector<8x128xf32>
    %5 = tpu.matmul %3, %4, %cst {dimension_numbers = #tpu.dot_dimension_numbers<[1], [0], [0], [1], [0, 0, 1, 1], [], []>} : vector<8x768xbf16>, vector<768x128xbf16>, vector<8x128xf32> -> vector<8x128xf32>
    %c0_4 = arith.constant 0 : index
    %c0_5 = arith.constant 0 : index
    %6 = vector.load %arg7[%c0_4, %c0_5] : memref<8x128xf32, #tpu.memory_space<vmem>>, vector<8x128xf32>
    tpu.vector_store %arg7[%c0_4, %c0_5], %5 {strides = array<i32>} : memref<8x128xf32, #tpu.memory_space<vmem>>, vector<8x128xf32>,
    return
  }
  func.func @transform_0(%arg0: i32) -> (i32, i32) {
    %c0_i32 = arith.constant 0 : i32
    %c0_i32_0 = arith.constant 0 : i32
    %c0_i32_1 = arith.constant 0 : i32
    return %c0_i32, %c0_i32_0 : i32, i32
  }
  func.func @transform_1(%arg0: i32) -> (i32, i32) {
    %c0_i32 = arith.constant 0 : i32
    %c0_i32_0 = arith.constant 0 : i32
    %c0_i32_1 = arith.constant 0 : i32
    return %c0_i32, %c0_i32_0 : i32, i32
  }
  func.func @transform_2(%arg0: i32) -> (i32, i32) {
    %c0_i32 = arith.constant 0 : i32
    %c0_i32_0 = arith.constant 0 : i32
    %c0_i32_1 = arith.constant 0 : i32
    return %c0_i32, %c0_i32_0 : i32, i32
  }
  func.func @transform_3(%arg0: i32) -> (i32, i32) {
    %c0_i32 = arith.constant 0 : i32
    %c0_i32_0 = arith.constant 0 : i32
    %c0_i32_1 = arith.constant 0 : i32
    return %c0_i32, %c0_i32_0 : i32, i32
  }
  func.func @transform_4(%arg0: i32) -> (i32, i32) {
    %c0_i32 = arith.constant 0 : i32
    %c0_i32_0 = arith.constant 0 : i32
    %c0_i32_1 = arith.constant 0 : i32
    return %c0_i32, %c0_i32_0 : i32, i32
  }
  func.func @transform_5(%arg0: i32) -> (i32, i32) {
    %c0_i32 = arith.constant 0 : i32
    %c0_i32_0 = arith.constant 0 : i32
    return %c0_i32, %arg0 : i32, i32
  }
  func.func @transform_6(%arg0: i32) -> (i32, i32) {
    %c0_i32 = arith.constant 0 : i32
    %c0_i32_0 = arith.constant 0 : i32
    return %c0_i32, %arg0 : i32, i32
  }
  func.func @transform_7(%arg0: i32) -> (i32, i32) {
    %c0_i32 = arith.constant 0 : i32
    %c0_i32_0 = arith.constant 0 : i32
    %c0_i32_1 = arith.constant 0 : i32
    return %c0_i32, %c0_i32_0 : i32, i32
  }
}

</mosaic_0001>

<bundles_post_ra>
// kernel: tpu_custom_call.1
= control target key start
LH: loop header
LB: loop body
LE: loop exit
PB: predicated region body
PF: predicated region fallthrough
CT: control target
= control target key end

     0   :  { %13 = vsyncpa [#allocation4], 0  ;;  %s2401_s0 = inlined_call_operand.hbm [shape: bf16[8,256], index: 0, kind: input, shape index: {}]   ;;  %s2402_s1 = inlined_call_operand.hbm [shape: bf16[256,768], index: 1, kind: input, shape index: {}]   ;;  %s2403_s2 = inlined_call_operand.hbm [shape: f32[1,768], index: 2, kind: input, shape index: {}]   ;;  %s2404_s3 = inlined_call_operand.hbm [shape: f32[1,768], index: 3, kind: input, shape index: {}]   ;;  %s2405_s4 = inlined_call_operand.vmem [shape: f32[1,768], index: 4, kind: input, shape index: {}]   ;;  %s2406_s5 = inlined_call_operand.hbm [shape: bf16[768,128], index: 5, kind: input, shape index: {}]   ;;  %s2407_s6 = inlined_call_operand.hbm [shape: f32[8,128], index: 6, kind: output, shape index: {0}]   ;;  %s2408_s7 = inlined_call_operand.hbm [shape: f32[8,768], index: 7, kind: output, shape index: {1}]  }
   0x1   :  { %14 = vsyncpa [#allocation7], 0 }
   0x2   :  { %15 = vsyncpa [#allocation10], 0 }
   0x3   :  { %16 = vsyncpa [#allocation5], 0 }
   0x4   :  { %17 = vsyncpa [#allocation14], 0  ;;  %s2230_s24 = smov [#allocation6]  }
   0x5   :  { %s33_s25 = sshll.u32 %s2230_s24, 4  ;;  %s34_s25 = int_to_ptr.vmem [resolvable:$true] %s33_s25 }
   0x6   :  { %s2088_s26 = scalar_lea.vmem %s34_s25, 12288  ;;  %p2093_p1 = scmp.lt.s32.totalorder %s34_s25, %s34_s25 }
   0x7   :  { %p2089_p0 = scmp.ne.s32.totalorder %s34_s25, %s2088_s26  ;;  %p2094_p2 = scmp.lt.s32.totalorder %s2088_s26, %s2088_s26 }
   0x9   :  { %p2095_p3 = por %p2094_p2, %p2093_p1 }
   0xb   :  { %p2096_p4 = pnand %p2095_p3, %p2089_p0 }
   0xd   :  { %2099 = shalt.err (!%p2096_p4)
}
   0xe   :  { %s2231_s27 = smov 384   ;;  %s2232_s28 = smov 24  }
   0xf   :  { %39 = dma.hbm_to_vmem [thread:$0]  %s2402_s1, 12288, %s34_s25, [#allocation7], %s2231_s27, %s2231_s27, %s2232_s28  }
  0x10   :  { %s2233_s8 = smov [#allocation9]   ;;  %s2234_s10 = smov [#allocation3]  }
  0x11   :  { %s56_s9 = sshll.u32 %s2233_s8, 4  ;;  %s24_s11 = sshll.u32 %s2234_s10, 4  ;;  %s57_s9 = int_to_ptr.vmem [resolvable:$true] %s56_s9  ;;  %s25_s11 = int_to_ptr.vmem [resolvable:$true] %s24_s11 }
  0x12   :  { %s2108_s12 = scalar_lea.vmem %s57_s9, 96  ;;  %p2113_p6 = scmp.lt.s32.totalorder %s57_s9, %s57_s9 }
  0x13   :  { %p2109_p5 = scmp.ne.s32.totalorder %s57_s9, %s2108_s12  ;;  %p2114_p7 = scmp.lt.s32.totalorder %s2108_s12, %s2108_s12 }
  0x15   :  { %p2115_p8 = por %p2114_p7, %p2113_p6 }
  0x17   :  { %p2116_p9 = pnand %p2115_p8, %p2109_p5 }
  0x19   :  { %2119 = shalt.err (!%p2116_p9)
}
  0x1a   :  { %59 = dma.hbm_to_vmem [thread:$0]  %s2404_s3, 96, %s57_s9, [#allocation10]  }
  0x1b   :  { %s2128_s15 = scalar_lea.vmem %s25_s11, 128  ;;  %p2133_p11 = scmp.lt.s32.totalorder %s25_s11, %s25_s11 }
  0x1c   :  { %p2129_p10 = scmp.ne.s32.totalorder %s25_s11, %s2128_s15  ;;  %p2134_p12 = scmp.lt.s32.totalorder %s2128_s15, %s2128_s15 }
  0x1e   :  { %p2135_p13 = por %p2134_p12, %p2133_p11 }
  0x20   :  { %p2136_p0 = pnand %p2135_p13, %p2129_p10 }
  0x22   :  { %2139 = shalt.err (!%p2136_p0)
}
  0x23   :  { %27 = dma.hbm_to_vmem [thread:$0]  %s2401_s0, 128, %s25_s11, [#allocation4]  }
  0x24   :  { %s2235_s17 = smov [#allocation8]   ;;  %s2236_s19 = smov [#allocation11]  }
  0x25   :  { %s46_s18 = sshll.u32 %s2235_s17, 4  ;;  %s67_s20 = sshll.u32 %s2236_s19, 4  ;;  %s47_s18 = int_to_ptr.vmem [resolvable:$true] %s46_s18  ;;  %s68_s20 = int_to_ptr.vmem [resolvable:$true] %s67_s20 }
  0x26   :  { %s2148_s21 = scalar_lea.vmem %s47_s18, 96  ;;  %p2153_p2 = scmp.lt.s32.totalorder %s47_s18, %s47_s18 }
  0x27   :  { %p2149_p1 = scmp.ne.s32.totalorder %s47_s18, %s2148_s21  ;;  %p2154_p3 = scmp.lt.s32.totalorder %s2148_s21, %s2148_s21 }
  0x29   :  { %p2155_p4 = por %p2154_p3, %p2153_p2 }
  0x2b   :  { %p2156_p5 = pnand %p2155_p4, %p2149_p1 }
  0x2d   :  { %2159 = shalt.err (!%p2156_p5)
}
  0x2e   :  { %49 = dma.hbm_to_vmem [thread:$0]  %s2403_s2, 96, %s47_s18, [#allocation7]  }
  0x2f   :  { %s2168_s23 = scalar_lea.vmem %s68_s20, 6144  ;;  %p2173_p7 = scmp.lt.s32.totalorder %s68_s20, %s68_s20 }
  0x30   :  { %p2169_p6 = scmp.ne.s32.totalorder %s68_s20, %s2168_s23  ;;  %p2174_p8 = scmp.lt.s32.totalorder %s2168_s23, %s2168_s23 }
  0x32   :  { %p2175_p9 = por %p2174_p8, %p2173_p7 }
  0x34   :  { %p2176_p10 = pnand %p2175_p9, %p2169_p6 }
  0x36   :  { %2179 = shalt.err (!%p2176_p10)
}
  0x37   :  { %s2237_s0 = smov 64   ;;  %s2238_s24 = smov 4  }
  0x38   :  { %73 = dma.hbm_to_vmem [thread:$0]  %s2406_s5, 6144, %s68_s20, [#allocation10], %s2237_s0, %s2237_s0, %s2238_s24  }
  0x39   :  { %2220 = dma.done.wait [#allocation4], 128  }
  0x3a   :  { %2221 = vsyncadd [#allocation4], 4294967168 }
  0x3b   :  { %2222 = dma.done.wait [#allocation7], 12384  }
  0x3c   :  { %2223 = vsyncadd [#allocation7], 4294954912 }
  0x3d   :  { %2224 = dma.done.wait [#allocation10], 6240  }
  0x3e   :  { %2225 = vsyncadd [#allocation10], 4294961056  ;;  %v1874_v0 = vld [vmem:[#allocation6 + $0x154] ss:$24 sps:$4 sm:$0xff]   ;;  %v1876_v1 = vld [vmem:[#allocation6 + $0x150] ss:$24 sps:$4 sm:$0xff]  }
  0x3f   :  { %710 = vmatprep.subr.bf16.mxu0 %v1874_v0  ;;  %v1877_v2 = vld [vmem:[#allocation6 + $0x124] ss:$24 sps:$4 sm:$0xff]   ;;  %v1879_v3 = vld [vmem:[#allocation6 + $0x120] ss:$24 sps:$4 sm:$0xff]   ;;  %v1880_v4 = vld [vmem:[#allocation6 + $0xf4] ss:$24 sps:$4 sm:$0xff]  }
  0x40   :  { %711 = vmatpush1.bf16.msra.mxu0 %v1876_v1  ;;  %v1885_v5 = vld [vmem:[#allocation6 + $0x15c] ss:$24 sps:$4 sm:$0xff]   ;;  %v1888_v6 = vld [vmem:[#allocation6 + $0x158] ss:$24 sps:$4 sm:$0xff]   ;;  %v1891_v9 = vld [vmem:[#allocation6 + $0x12c] ss:$24 sps:$4 sm:$0xff]  }
  0x41   :  { %712 = vmatprep.subr.bf16.mxu0 %v1877_v2  ;;  %v1882_v7 = vld [vmem:[#allocation6 + $0xf0] ss:$24 sps:$4 sm:$0xff]   ;;  %751 = vmatprep.subr.bf16.mxu1 %v1885_v5  ;;  %v1883_v8 = vld [vmem:[#allocation6 + $0xc4] ss:$24 sps:$4 sm:$0xff]   ;;  %v1887_v11 = vld [vmem:[#allocation6 + $0xc0] ss:$24 sps:$4 sm:$0xff]  }
  0x42   :  { %752 = vmatpush1.bf16.msra.mxu1 %v1888_v6  ;;  %v1894_v10 = vld [vmem:[#allocation6 + $0x128] ss:$24 sps:$4 sm:$0xff]   ;;  %v1889_v12 = vld [vmem:[#allocation6 + $0x94] ss:$24 sps:$4 sm:$0xff]   ;;  %v1900_v14 = vld [vmem:[#allocation6 + $0xf8] ss:$24 sps:$4 sm:$0xff]  }
  0x43   :  { %753 = vmatprep.subr.bf16.mxu1 %v1891_v9  ;;  %v1897_v13 = vld [vmem:[#allocation6 + $0xfc] ss:$24 sps:$4 sm:$0xff]   ;;  %v1903_v15 = vld [vmem:[#allocation6 + $0xcc] ss:$24 sps:$4 sm:$0xff]   ;;  %v1893_v16 = vld [vmem:[#allocation6 + $0x90] ss:$24 sps:$4 sm:$0xff]  }
  0x44   :  { %713 = vmatpush1.bf16.msra.mxu0 %v1879_v3  ;;  %v1895_v17 = vld [vmem:[#allocation6 + $0x64] ss:$24 sps:$4 sm:$0xff]   ;;  %v1906_v18 = vld [vmem:[#allocation6 + $0xc8] ss:$24 sps:$4 sm:$0xff]   ;;  %v1901_v21 = vld [vmem:[#allocation6 + $0x34] ss:$24 sps:$4 sm:$0xff]  }
  0x45   :  { %714 = vmatprep.subr.bf16.mxu0 %v1880_v4  ;;  %v1909_v19 = vld [vmem:[#allocation6 + $0x9c] ss:$24 sps:$4 sm:$0xff]   ;;  %v1899_v20 = vld [vmem:[#allocation6 + $0x60] ss:$24 sps:$4 sm:$0xff]   ;;  %v1915_v23 = vld [vmem:[#allocation6 + $0x6c] ss:$24 sps:$4 sm:$0xff]  }
  0x46   :  { %754 = vmatpush1.bf16.msra.mxu1 %v1894_v10  ;;  %v1912_v22 = vld [vmem:[#allocation6 + $0x98] ss:$24 sps:$4 sm:$0xff]   ;;  %v1907_v25 = vld [vmem:[#allocation6 + $0x4] ss:$24 sps:$4 sm:$0xff]   ;;  %v1918_v26 = vld [vmem:[#allocation6 + $0x68] ss:$24 sps:$4 sm:$0xff]  }
  0x47   :  { %755 = vmatprep.subr.bf16.mxu1 %v1897_v13  ;;  %v1905_v24 = vld [vmem:[#allocation6 + $0x30] ss:$24 sps:$4 sm:$0xff]   ;;  %v1921_v27 = vld [vmem:[#allocation6 + $0x3c] ss:$24 sps:$4 sm:$0xff]   ;;  %v1911_v28 = vld [vmem:[#allocation6] ss:$24 sps:$4 sm:$0xff]  }
  0x48   :  { %715 = vmatpush1.bf16.msra.mxu0 %v1882_v7  ;;  %v1913_v29 = vld [vmem:[#allocation6 + $0x2d4] ss:$24 sps:$4 sm:$0xff]   ;;  %v1924_v30 = vld [vmem:[#allocation6 + $0x38] ss:$24 sps:$4 sm:$0xff]   ;;  %v1919_v33 = vld [vmem:[#allocation6 + $0x2a4] ss:$24 sps:$4 sm:$0xff]  }
  0x49   :  { %716 = vmatprep.subr.bf16.mxu0 %v1883_v8  ;;  %v1927_v31 = vld [vmem:[#allocation6 + $0xc] ss:$24 sps:$4 sm:$0xff]   ;;  %v1917_v32 = vld [vmem:[#allocation6 + $0x2d0] ss:$24 sps:$4 sm:$0xff]   ;;  %v1933_v35 = vld [vmem:[#allocation6 + $0x2dc] ss:$24 sps:$4 sm:$0xff]  }
  0x4a   :  { %756 = vmatpush1.bf16.msra.mxu1 %v1900_v14  ;;  %v1930_v34 = vld [vmem:[#allocation6 + $0x8] ss:$24 sps:$4 sm:$0xff]   ;;  %v1925_v37 = vld [vmem:[#allocation6 + $0x274] ss:$24 sps:$4 sm:$0xff]   ;;  %v1936_v38 = vld [vmem:[#allocation6 + $0x2d8] ss:$24 sps:$4 sm:$0xff]  }
  0x4b   :  { %757 = vmatprep.subr.bf16.mxu1 %v1903_v15  ;;  %v1923_v36 = vld [vmem:[#allocation6 + $0x2a0] ss:$24 sps:$4 sm:$0xff]   ;;  %v1939_v39 = vld [vmem:[#allocation6 + $0x2ac] ss:$24 sps:$4 sm:$0xff]   ;;  %v1929_v40 = vld [vmem:[#allocation6 + $0x270] ss:$24 sps:$4 sm:$0xff]  }
  0x4c   :  { %717 = vmatpush1.bf16.msra.mxu0 %v1887_v11  ;;  %v94_v41 = vld [vmem:[#allocation3] sm:$0xff]  ;;  %v1942_v44 = vld [vmem:[#allocation6 + $0x2a8] ss:$24 sps:$4 sm:$0xff]   ;;  %v1937_v47 = vld [vmem:[#allocation6 + $0x214] ss:$24 sps:$4 sm:$0xff]  }
  0x4d   :  { %718 = vmatprep.subr.bf16.mxu0 %v1889_v12  ;;  %v1931_v42 = vld [vmem:[#allocation6 + $0x244] ss:$24 sps:$4 sm:$0xff]   ;;  %v1634_v43 = vcombine.high %v94_v41, %v94_v41  ;;  %v1935_v46 = vld [vmem:[#allocation6 + $0x240] ss:$24 sps:$4 sm:$0xff]   ;;  %v1941_v50 = vld [vmem:[#allocation6 + $0x210] ss:$24 sps:$4 sm:$0xff]   ;;  %v2296_v2 = vcombine.low %v94_v41, %v94_v41 }
  0x4e   :  { %758 = vmatpush1.bf16.msra.mxu1 %v1906_v18  ;;  %v1945_v45 = vld [vmem:[#allocation6 + $0x27c] ss:$24 sps:$4 sm:$0xff]   ;;  %v1948_v48 = vld [vmem:[#allocation6 + $0x278] ss:$24 sps:$4 sm:$0xff]   ;;  %v1951_v49 = vld [vmem:[#allocation6 + $0x24c] ss:$24 sps:$4 sm:$0xff]  }
  0x4f   :  { %759 = vmatprep.subr.bf16.mxu1 %v1909_v19  ;;  %742 = vmatprep.mubr.bf16.mxu0 %v1634_v43  ;;  %v1943_v51 = vld [vmem:[#allocation6 + $0x1e4] ss:$24 sps:$4 sm:$0xff]   ;;  %v1954_v52 = vld [vmem:[#allocation6 + $0x248] ss:$24 sps:$4 sm:$0xff]   ;;  %v1949_v55 = vld [vmem:[#allocation6 + $0x1b4] ss:$24 sps:$4 sm:$0xff]  }
  0x50   :  { %719 = vmatpush1.bf16.msra.mxu0 %v1893_v16  ;;  %783 = vmatprep.mubr.bf16.mxu1 %v1634_v43  ;;  %v1957_v53 = vld [vmem:[#allocation6 + $0x21c] ss:$24 sps:$4 sm:$0xff]   ;;  %v1947_v54 = vld [vmem:[#allocation6 + $0x1e0] ss:$24 sps:$4 sm:$0xff]   ;;  %v1963_v57 = vld [vmem:[#allocation6 + $0x1ec] ss:$24 sps:$4 sm:$0xff]  }
  0x51   :  { %720 = vmatprep.subr.bf16.mxu0 %v1895_v17  ;;  %v1960_v56 = vld [vmem:[#allocation6 + $0x218] ss:$24 sps:$4 sm:$0xff]   ;;  %v1955_v59 = vld [vmem:[#allocation6 + $0x184] ss:$24 sps:$4 sm:$0xff]   ;;  %v1968_v60 = vld [vmem:[#allocation6 + $0x1e8] ss:$24 sps:$4 sm:$0xff]  }
  0x52   :  { %760 = vmatpush1.bf16.msra.mxu1 %v1912_v22  ;;  %v1953_v58 = vld [vmem:[#allocation6 + $0x1b0] ss:$24 sps:$4 sm:$0xff]   ;;  %v1969_v61 = vld [vmem:[#allocation6 + $0x1bc] ss:$24 sps:$4 sm:$0xff]   ;;  %v1959_v62 = vld [vmem:[#allocation6 + $0x180] ss:$24 sps:$4 sm:$0xff]  }
  0x53   :  { %761 = vmatprep.subr.bf16.mxu1 %v1915_v23  ;;  %v1967_v63 = vld [vmem:[#allocation6 + $0x164] ss:$24 sps:$4 sm:$0xff]   ;;  %v1974_v0 = vld [vmem:[#allocation6 + $0x1b8] ss:$24 sps:$4 sm:$0xff]   ;;  %v1973_v4 = vld [vmem:[#allocation6 + $0x134] ss:$24 sps:$4 sm:$0xff]  }
  0x54   :  { %721 = vmatpush1.bf16.msra.mxu0 %v1899_v20  ;;  %v1975_v1 = vld [vmem:[#allocation6 + $0x18c] ss:$24 sps:$4 sm:$0xff]   ;;  %v1965_v3 = vld [vmem:[#allocation6 + $0x160] ss:$24 sps:$4 sm:$0xff]   ;;  %v1971_v6 = vld [vmem:[#allocation6 + $0x130] ss:$24 sps:$4 sm:$0xff]  }
  0x55   :  { %722 = vmatprep.subr.bf16.mxu0 %v1901_v21  ;;  %v1980_v5 = vld [vmem:[#allocation6 + $0x188] ss:$24 sps:$4 sm:$0xff]   ;;  %v1979_v7 = vld [vmem:[#allocation6 + $0x104] ss:$24 sps:$4 sm:$0xff]   ;;  %v1983_v9 = vld [vmem:[#allocation6 + $0xd4] ss:$24 sps:$4 sm:$0xff]  }
  0x56   :  { %762 = vmatpush1.bf16.msra.mxu1 %v1918_v26  ;;  %v1977_v8 = vld [vmem:[#allocation6 + $0x100] ss:$24 sps:$4 sm:$0xff]   ;;  %v1981_v10 = vld [vmem:[#allocation6 + $0xd0] ss:$24 sps:$4 sm:$0xff]   ;;  %v1986_v11 = vld [vmem:[#allocation6 + $0xa4] ss:$24 sps:$4 sm:$0xff]  }
  0x57   :  { %763 = vmatprep.subr.bf16.mxu1 %v1921_v27  ;;  %v1984_v12 = vld [vmem:[#allocation6 + $0xa0] ss:$24 sps:$4 sm:$0xff]   ;;  %v1989_v13 = vld [vmem:[#allocation6 + $0x74] ss:$24 sps:$4 sm:$0xff]   ;;  %v1987_v14 = vld [vmem:[#allocation6 + $0x70] ss:$24 sps:$4 sm:$0xff]  }
  0x58   :  { %723 = vmatpush1.bf16.msra.mxu0 %v1905_v24  ;;  %v1992_v15 = vld [vmem:[#allocation6 + $0x44] ss:$24 sps:$4 sm:$0xff]   ;;  %v1990_v16 = vld [vmem:[#allocation6 + $0x40] ss:$24 sps:$4 sm:$0xff]   ;;  %v1995_v17 = vld [vmem:[#allocation6 + $0x14] ss:$24 sps:$4 sm:$0xff]  }
  0x59   :  { %724 = vmatprep.subr.bf16.mxu0 %v1907_v25  ;;  %v1993_v18 = vld [vmem:[#allocation6 + $0x10] ss:$24 sps:$4 sm:$0xff]   ;;  %v1998_v19 = vld [vmem:[#allocation6 + $0x2e4] ss:$24 sps:$4 sm:$0xff]   ;;  %v1996_v20 = vld [vmem:[#allocation6 + $0x2e0] ss:$24 sps:$4 sm:$0xff]  }
  0x5a   :  { %764 = vmatpush1.bf16.msra.mxu1 %v1924_v30  ;;  %v2001_v21 = vld [vmem:[#allocation6 + $0x2b4] ss:$24 sps:$4 sm:$0xff]   ;;  %v1999_v22 = vld [vmem:[#allocation6 + $0x2b0] ss:$24 sps:$4 sm:$0xff]   ;;  %v2004_v23 = vld [vmem:[#allocation6 + $0x284] ss:$24 sps:$4 sm:$0xff]  }
  0x5b   :  { %765 = vmatprep.subr.bf16.mxu1 %v1927_v31  ;;  %v2002_v24 = vld [vmem:[#allocation6 + $0x280] ss:$24 sps:$4 sm:$0xff]   ;;  %v2007_v25 = vld [vmem:[#allocation6 + $0x254] ss:$24 sps:$4 sm:$0xff]   ;;  %v2005_v26 = vld [vmem:[#allocation6 + $0x250] ss:$24 sps:$4 sm:$0xff]  }
  0x5c   :  { %725 = vmatpush1.bf16.msra.mxu0 %v1911_v28  ;;  %v2010_v27 = vld [vmem:[#allocation6 + $0x224] ss:$24 sps:$4 sm:$0xff]   ;;  %v2008_v28 = vld [vmem:[#allocation6 + $0x220] ss:$24 sps:$4 sm:$0xff]   ;;  %v2011_v30 = vld [vmem:[#allocation6 + $0x1f0] ss:$24 sps:$4 sm:$0xff]  }
  0x5d   :  { %726 = vmatprep.subr.bf16.mxu0 %v1913_v29  ;;  %v2013_v29 = vld [vmem:[#allocation6 + $0x1f4] ss:$24 sps:$4 sm:$0xff]   ;;  %v2016_v31 = vld [vmem:[#allocation6 + $0x1c4] ss:$24 sps:$4 sm:$0xff]  }
  0x5e   :  { %766 = vmatpush1.bf16.msra.mxu1 %v1930_v34  ;;  %v2017_v34 = vld [vmem:[#allocation6 + $0x190] ss:$24 sps:$4 sm:$0xff]  }
  0x5f   :  { %767 = vmatprep.subr.bf16.mxu1 %v1933_v35  ;;  %v2020_v35 = vld [vmem:[#allocation11 + $0x78] sm:$0xff]   ;;  %v2026_v41 = vld [vmem:[#allocation11 + $0x60] sm:$0xff]  }
  0x60   :  { %727 = vmatpush2.bf16.msra.mxu0 %v1917_v32  ;;  %v2014_v32 = vld [vmem:[#allocation6 + $0x1c0] ss:$24 sps:$4 sm:$0xff]  }
  0x61   :  { %728 = vmatprep.subr.bf16.mxu0 %v1919_v33  ;;  %v2019_v33 = vld [vmem:[#allocation6 + $0x194] ss:$24 sps:$4 sm:$0xff]  }
  0x62   :  { %768 = vmatpush2.bf16.msra.mxu1 %v1936_v38  ;;  %v2023_v38 = vld [vmem:[#allocation11 + $0x30] sm:$0xff]  }
  0x63   :  { %769 = vmatprep.subr.bf16.mxu1 %v1939_v39  ;;  %v2024_v39 = vld [vmem:[#allocation11 + $0x68] sm:$0xff]  }
  0x64   :  { %729 = vmatpush2.bf16.msra.mxu0 %v1923_v36  ;;  %v2021_v36 = vld [vmem:[#allocation11 + $0x38] sm:$0xff]  }
  0x65   :  { %730 = vmatprep.subr.bf16.mxu0 %v1925_v37  ;;  %v2022_v37 = vld [vmem:[#allocation11 + $0x70] sm:$0xff]  }
  0x66   :  { %770 = vmatpush2.bf16.msra.mxu1 %v1942_v44  ;;  %v2029_v44 = vld [vmem:[#allocation11 + $0x18] sm:$0xff]  }
  0x67   :  { %771 = vmatprep.subr.bf16.mxu1 %v1945_v45  ;;  %v2030_v45 = vld [vmem:[#allocation11 + $0x50] sm:$0xff]  }
  0x68   :  { %731 = vmatpush2.bf16.msra.mxu0 %v1929_v40  ;;  %v2025_v40 = vld [vmem:[#allocation11 + $0x28] sm:$0xff]  }
  0x69   :  { %732 = vmatprep.subr.bf16.mxu0 %v1931_v42  ;;  %v2027_v42 = vld [vmem:[#allocation11 + $0x20] sm:$0xff]  }
  0x6a   :  { %772 = vmatpush2.bf16.msra.mxu1 %v1948_v48  ;;  %v2033_v48 = vld [vmem:[#allocation11 + $0x8] sm:$0xff]  }
  0x6b   :  { %773 = vmatprep.subr.bf16.mxu1 %v1951_v49  ;;  %v2034_v49 = vld [vmem:[#allocation11 + $0x40] sm:$0xff]  }
  0x6c   :  { %733 = vmatpush2.bf16.msra.mxu0 %v1935_v46  ;;  %v2031_v46 = vld [vmem:[#allocation11 + $0x10] sm:$0xff]  }
  0x6d   :  { %734 = vmatprep.subr.bf16.mxu0 %v1937_v47  ;;  %v2032_v47 = vld [vmem:[#allocation11 + $0x48] sm:$0xff]  }
  0x6e   :  { %774 = vmatpush2.bf16.msra.mxu1 %v1954_v52  ;;  %v2052_v52 = vld [vmem:[#allocation11 + $0x178] sm:$0xff]  }
  0x6f   :  { %775 = vmatprep.subr.bf16.mxu1 %v1957_v53  ;;  %v2053_v53 = vld [vmem:[#allocation11 + $0x138] sm:$0xff]  }
  0x70   :  { %735 = vmatpush2.bf16.msra.mxu0 %v1941_v50  ;;  %v2035_v50 = vld [vmem:[#allocation11] sm:$0xff]  }
  0x71   :  { %736 = vmatprep.subr.bf16.mxu0 %v1943_v51  ;;  %v2036_v51 = vld [vmem:[#allocation11 + $0xf8] sm:$0xff]  }
  0x72   :  { %776 = vmatpush2.bf16.msra.mxu1 %v1960_v56  ;;  %v2056_v56 = vld [vmem:[#allocation11 + $0x168] sm:$0xff]  }
  0x73   :  { %777 = vmatprep.subr.bf16.mxu1 %v1963_v57  ;;  %v2057_v57 = vld [vmem:[#allocation11 + $0x128] sm:$0xff]  }
  0x74   :  { %737 = vmatpush2.bf16.msra.mxu0 %v1947_v54  ;;  %v2054_v54 = vld [vmem:[#allocation11 + $0x170] sm:$0xff]  }
  0x75   :  { %738 = vmatprep.subr.bf16.mxu0 %v1949_v55  ;;  %v2055_v55 = vld [vmem:[#allocation11 + $0x130] sm:$0xff]  }
  0x76   :  { %778 = vmatpush2.bf16.msra.mxu1 %v1968_v60  ;;  %v2060_v60 = vld [vmem:[#allocation11 + $0x158] sm:$0xff]  }
  0x77   :  { %779 = vmatprep.subr.bf16.mxu1 %v1969_v61  ;;  %v2061_v61 = vld [vmem:[#allocation11 + $0x118] sm:$0xff]  }
  0x78   :  { %739 = vmatpush2.bf16.msra.mxu0 %v1953_v58  ;;  %v2058_v58 = vld [vmem:[#allocation11 + $0x160] sm:$0xff]  }
  0x79   :  { %740 = vmatprep.subr.bf16.mxu0 %v1955_v59  ;;  %v2059_v59 = vld [vmem:[#allocation11 + $0x120] sm:$0xff]  }
  0x7a   :  { %780 = vmatpush2.bf16.msra.mxu1 %v1974_v0  ;;  %v2063_v0 = vld [vmem:[#allocation11 + $0x110] sm:$0xff]  }
  0x7b   :  { %781 = vmatprep.subr.bf16.mxu1 %v1975_v1 }
  0x7c   :  { %741 = vmatpush2.bf16.msra.mxu0 %v1959_v62  ;;  %v193_v62 = vlaneseq }
  0x7d   :  { %792 = vmatprep.subr.bf16.mxu0 %v1967_v63  ;;  %v2062_v63 = vld [vmem:[#allocation11 + $0x150] sm:$0xff]  }
  0x7e   :  { %782 = vmatpush2.bf16.msra.mxu1 %v1980_v5  ;;  %v2301_v1 = vshrl.u32 %v193_v62, 7 }
  0x7f   :  { %743 = vmatmul.mubr.bf16.vlgmr.msra.gmra.mxu0 %v2296_v2  ;;  %1797 = vmatprep.subr.bf16.mxu1 %v2020_v35 }
  0x80   :  { %793 = vmatpush1.bf16.msra.mxu0 %v1965_v3  ;;  %824 = vmatprep.mubr.bf16.mxu0 %v1634_v43  ;;  %v2028_v43 = vld [vmem:[#allocation11 + $0x58] sm:$0xff]   ;;  %v2065_v3 = vld [vmem:[#allocation11 + $0x108] sm:$0xff]   ;;  %v2304_v5 = vsub.s32 0, %v2301_v1  ;;  %vm841_vm0 = vcmp.lt.s32.totalorder %v2301_v1, 2 }
  0x81   :  { %794 = vmatprep.subr.bf16.mxu0 %v1973_v4  ;;  %784 = vmatmul.mubr.bf16.vlgmr.msra.gmra.mxu1 %v2296_v2  ;;  %v2066_v4 = vld [vmem:[#allocation11 + $0x140] sm:$0xff]  }
  0x82   :  { %1798 = vmatpush3.bf16.msra.mxu1 %v2021_v36 }
  0x83   :  { %1799 = vmatprep.subr.bf16.mxu1 %v2022_v37 }
  0x84   :  { %795 = vmatpush1.bf16.msra.mxu0 %v1971_v6  ;;  %v2306_v6 = vld [vmem:[#allocation8] sm:$0x3f] }
  0x85   :  { %796 = vmatprep.subr.bf16.mxu0 %v1979_v7  ;;  %v2067_v7 = vld [vmem:[#allocation11 + $0x100] sm:$0xff]  }
  0x86   :  { %1800 = vmatpush3.bf16.msra.mxu1 %v2023_v38 }
  0x87   :  { %1801 = vmatprep.subr.bf16.mxu1 %v2024_v39 }
  0x88   :  { %797 = vmatpush1.bf16.msra.mxu0 %v1977_v8  ;;  %v2309_v8 = vsub.s32 1, %v2301_v1 }
  0x89   :  { %798 = vmatprep.subr.bf16.mxu0 %v1983_v9  ;;  %v196_v9 = vrot.slane %v2306_v6, %v2304_v5 }
  0x8a   :  { %1802 = vmatpush3.bf16.msra.mxu1 %v2025_v40 }
  0x8b   :  { %1803 = vmatprep.subr.bf16.mxu1 %v2026_v41 }
  0x8c   :  { %799 = vmatpush1.bf16.msra.mxu0 %v1981_v10  ;;  %v2314_v10 = vsub.s32 2, %v2301_v1 }
  0x8d   :  { %800 = vmatprep.subr.bf16.mxu0 %v1986_v11  ;;  %v200_v11 = vrot.slane %v2306_v6, %v2309_v8 }
  0x8e   :  { %1804 = vmatpush3.bf16.msra.mxu1 %v2027_v42 }
  0x8f   :  { %1805 = vmatprep.subr.bf16.mxu1 %v2028_v43 }
  0x90   :  { %801 = vmatpush1.bf16.msra.mxu0 %v1984_v12 }
  0x91   :  { %802 = vmatprep.subr.bf16.mxu0 %v1989_v13  ;;  %v2320_v13 = vsub.s32 3, %v2301_v1 }
  0x92   :  { %1806 = vmatpush3.bf16.msra.mxu1 %v2029_v44 }
  0x93   :  { %1807 = vmatprep.subr.bf16.mxu1 %v2030_v45 }
  0x94   :  { %803 = vmatpush1.bf16.msra.mxu0 %v1987_v14 }
  0x95   :  { %804 = vmatprep.subr.bf16.mxu0 %v1992_v15 }
  0x96   :  { %1808 = vmatpush3.bf16.msra.mxu1 %v2031_v46 }
  0x97   :  { %1809 = vmatprep.subr.bf16.mxu1 %v2032_v47 }
  0x98   :  { %805 = vmatpush1.bf16.msra.mxu0 %v1990_v16  ;;  %v204_v16 = vrot.slane %v2306_v6, %v2314_v10 }
  0x99   :  { %806 = vmatprep.subr.bf16.mxu0 %v1995_v17 }
  0x9a   :  { %1810 = vmatpush3.bf16.msra.mxu1 %v2033_v48 }
  0x9b   :  { %1811 = vmatprep.subr.bf16.mxu1 %v2034_v49 }
  0x9c   :  { %807 = vmatpush1.bf16.msra.mxu0 %v1993_v18 }
  0x9d   :  { %808 = vmatprep.subr.bf16.mxu0 %v1998_v19 }
  0x9e   :  { %1812 = vmatpush3.bf16.msra.mxu1 %v2035_v50 }
  0x9f   :  { %1819 = vmatprep.subr.bf16.mxu1 %v2036_v51 }
  0xa0   :  { %809 = vmatpush2.bf16.msra.mxu0 %v1996_v20 }
  0xa1   :  { %810 = vmatprep.subr.bf16.mxu0 %v2001_v21  ;;  %v208_v21 = vrot.slane %v2306_v6, %v2320_v13 }
  0xa4   :  { %811 = vmatpush2.bf16.msra.mxu0 %v1999_v22 }
  0xa5   :  { %812 = vmatprep.subr.bf16.mxu0 %v2004_v23 }
  0xa8   :  { %813 = vmatpush2.bf16.msra.mxu0 %v2002_v24 }
  0xa9   :  { %814 = vmatprep.subr.bf16.mxu0 %v2007_v25 }
  0xac   :  { %815 = vmatpush2.bf16.msra.mxu0 %v2005_v26 }
  0xad   :  { %816 = vmatprep.subr.bf16.mxu0 %v2010_v27 }
  0xb0   :  { %817 = vmatpush2.bf16.msra.mxu0 %v2008_v28 }
  0xb1   :  { %818 = vmatprep.subr.bf16.mxu0 %v2013_v29 }
  0xb4   :  { %819 = vmatpush2.bf16.msra.mxu0 %v2011_v30 }
  0xb5   :  { %820 = vmatprep.subr.bf16.mxu0 %v2016_v31 }
  0xb8   :  { %821 = vmatpush2.bf16.msra.mxu0 %v2014_v32 }
  0xb9   :  { %822 = vmatprep.subr.bf16.mxu0 %v2019_v33 }
  0xbc   :  { %823 = vmatpush2.bf16.msra.mxu0 %v2017_v34 }
  0xbd   :  { %1841 = vmatprep.subr.bf16.mxu0 %v2052_v52 }
  0xbf   :  { %825 = vmatmul.mubr.bf16.vlgmr.msra.gmra.mxu0 %v2296_v2  ;;  %v2064_v2 = vld [vmem:[#allocation11 + $0x148] sm:$0xff]  }
  0xc0   :  { %1842 = vmatpush3.bf16.msra.mxu0 %v2053_v53 }
  0xc1   :  { %1843 = vmatprep.subr.bf16.mxu0 %v2054_v54 }
  0xc4   :  { %1844 = vmatpush3.bf16.msra.mxu0 %v2055_v55 }
  0xc5   :  { %1845 = vmatprep.subr.bf16.mxu0 %v2056_v56 }
  0xc8   :  { %1846 = vmatpush3.bf16.msra.mxu0 %v2057_v57 }
  0xc9   :  { %1847 = vmatprep.subr.bf16.mxu0 %v2058_v58 }
  0xcc   :  { %1848 = vmatpush3.bf16.msra.mxu0 %v2059_v59 }
  0xcd   :  { %1849 = vmatprep.subr.bf16.mxu0 %v2060_v60 }
  0xd0   :  { %1850 = vmatpush3.bf16.msra.mxu0 %v2061_v61 }
  0xd1   :  { %1851 = vmatprep.subr.bf16.mxu0 %v2062_v63 }
  0xd4   :  { %1852 = vmatpush3.bf16.msra.mxu0 %v2063_v0 }
  0xd5   :  { %1853 = vmatprep.subr.bf16.mxu0 %v2064_v2 }
  0xd8   :  { %1854 = vmatpush3.bf16.msra.mxu0 %v2065_v3 }
  0xd9   :  { %1855 = vmatprep.subr.bf16.mxu0 %v2066_v4 }
  0xdc   :  { %1856 = vmatpush3.bf16.msra.mxu0 %v2067_v7 }
 0x13f   :  { %v744_v12 = vpop.f32.mrf.mxu0 }
 0x140   :  { %v745_v14 = vadd.f32 %v744_v12, %v196_v9 }
 0x141   :  { %v746_v15 = vpop.f32.mrf.mxu0  ;;  %v785_v23 = vpop.f32.mrf.mxu1 }
 0x142   :  { %833 = vst [vmem:[#allocation13] sm:$0xff] %v745_v14  ;;  %v844_v17 = vsel %vm841_vm0, %v745_v14, 0.0  ;;  %v747_v18 = vadd.f32 %v746_v15, %v200_v11  ;;  %v786_v27 = vadd.f32 %v785_v23, %v204_v16 }
 0x143   :  { %v850_v19 = vrot.slane %v844_v17, 4  ;;  %v748_v20 = vpop.f32.mrf.mxu0  ;;  %v787_v28 = vpop.f32.mrf.mxu1 }
 0x144   :  { %834 = vst [vmem:[#allocation13 + $0x8] sm:$0xff] %v747_v18  ;;  %v845_v22 = vsel %vm841_vm0, %v747_v18, 0.0  ;;  %835 = vst [vmem:[#allocation13 + $0x10] sm:$0xff] %v786_v27  ;;  %v846_v31 = vsel %vm841_vm0, %v786_v27, 0.0  ;;  %v788_v32 = vadd.f32 %v787_v28, %v208_v21 }
 0x145   :  { %v851_v24 = vadd.f32 %v850_v19, %v844_v17  ;;  %v856_v25 = vrot.slane %v845_v22, 4  ;;  %v749_v26 = vpop.f32.mrf.mxu0  ;;  %v862_v33 = vrot.slane %v846_v31, 4  ;;  %v789_v34 = vpop.f32.mrf.mxu1 }
 0x146   :  { %836 = vst [vmem:[#allocation13 + $0x18] sm:$0xff] %v788_v32  ;;  %v847_v37 = vsel %vm841_vm0, %v788_v32, 0.0 }
 0x147   :  { %v852_v29 = vrot.slane %v851_v24, 2  ;;  %v857_v30 = vadd.f32 %v856_v25, %v845_v22  ;;  %v863_v38 = vadd.f32 %v862_v33, %v846_v31  ;;  %v868_v39 = vrot.slane %v847_v37, 4  ;;  %v790_v40 = vpop.f32.mrf.mxu1 }
 0x149   :  { %v853_v35 = vadd.f32 %v852_v29, %v851_v24  ;;  %v858_v36 = vrot.slane %v857_v30, 2  ;;  %v864_v43 = vrot.slane %v863_v38, 2  ;;  %v869_v44 = vadd.f32 %v868_v39, %v847_v37 }
 0x14b   :  { %v854_v41 = vrot.slane %v853_v35, 1  ;;  %v859_v42 = vadd.f32 %v858_v36, %v857_v30  ;;  %v865_v47 = vadd.f32 %v864_v43, %v863_v38  ;;  %v870_v48 = vrot.slane %v869_v44, 2 }
 0x14d   :  { %v855_v45 = vadd.f32 %v854_v41, %v853_v35  ;;  %v860_v46 = vrot.slane %v859_v42, 1  ;;  %v866_v51 = vrot.slane %v865_v47, 1  ;;  %v871_v52 = vadd.f32 %v870_v48, %v869_v44  ;;  %v2345_v41 = vld [vmem:[#allocation9] sm:$0x3f]  ;;  %v2352_v44 = vld [vmem:[%s2405_s4] sm:$0x3f] }
 0x14e   :  { %v975_v43 = vrot.slane %v2345_v41, %v2304_v5  ;;  %s2239_s4 = smov [#allocation13]  }
 0x14f   :  { %v886_v49 = vmul.f32 0.5, %v855_v45  ;;  %v861_v50 = vadd.f32 %v860_v46, %v859_v42  ;;  %v867_v55 = vadd.f32 %v866_v51, %v865_v47  ;;  %v872_v56 = vrot.slane %v871_v52, 1  ;;  %s1618_s27 = sshll.u32 %s2239_s4, 4  ;;  %s1619_s27 = int_to_ptr.vmem [resolvable:$true] %s1618_s27 }
 0x150   :  { %v979_v47 = vrot.slane %v2345_v41, %v2309_v8  ;;  %s2180_s28 = scalar_lea.vmem %s1619_s27, 768  ;;  %p2185_p12 = scmp.lt.s32.totalorder %s1619_s27, %s1619_s27 }
 0x151   :  { %v892_v53 = vsub.f32 %v745_v14, %v886_v49  ;;  %v887_v54 = vmul.f32 0.5, %v861_v50  ;;  %v888_v60 = vmul.f32 0.5, %v867_v55  ;;  %v873_v61 = vadd.f32 %v872_v56, %v871_v52  ;;  %p2181_p11 = scmp.ne.s32.totalorder %s1619_s27, %s2180_s28  ;;  %p2186_p13 = scmp.lt.s32.totalorder %s2180_s28, %s2180_s28 }
 0x152   :  { %v1013_v50 = vrot.slane %v2352_v44, %v2304_v5  ;;  %v2361_v56 = vsub.s32 4, %v2301_v1 }
 0x153   :  { %v898_v57 = vsel %vm841_vm0, %v892_v53, 0.0  ;;  %v893_v58 = vsub.f32 %v747_v18, %v887_v54  ;;  %v2338_v2 = vsub.f32 %v786_v27, %v888_v60  ;;  %v889_v3 = vmul.f32 0.5, %v873_v61  ;;  %p2187_p0 = por %p2186_p13, %p2185_p12 }
 0x154   :  { %v904_v59 = vmul.f32 %v898_v57, %v898_v57  ;;  %v1017_v54 = vrot.slane %v2352_v44, %v2309_v8  ;;  %v212_v8 = vrot.slane %v2306_v6, %v2361_v56 }
 0x155   :  { %v899_v62 = vsel %vm841_vm0, %v893_v58, 0.0  ;;  %v895_v9 = vsub.f32 %v788_v32, %v889_v3  ;;  %v900_v14 = vsel %vm841_vm0, %v2338_v2, 0.0  ;;  %p2188_p1 = pnand %p2187_p0, %p2181_p11 }
 0x156   :  { %v910_v63 = vrot.slane %v904_v59, 4  ;;  %v905_v0 = vmul.f32 %v899_v62, %v899_v62  ;;  %v906_v19 = vmul.f32 %v900_v14, %v900_v14  ;;  %v2366_v62 = vsub.s32 5, %v2301_v1 }
 0x157   :  { %v901_v15 = vsel %vm841_vm0, %v895_v9, 0.0 }
 0x158   :  { %v911_v4 = vadd.f32 %v910_v63, %v904_v59  ;;  %v916_v7 = vrot.slane %v905_v0, 4  ;;  %v907_v16 = vmul.f32 %v901_v15, %v901_v15  ;;  %v922_v26 = vrot.slane %v906_v19, 4 }
 0x15a   :  { %v912_v11 = vrot.slane %v911_v4, 2  ;;  %v917_v12 = vadd.f32 %v916_v7, %v905_v0  ;;  %v928_v20 = vrot.slane %v907_v16, 4  ;;  %v923_v33 = vadd.f32 %v922_v26, %v906_v19  ;;  %v2037_v0 = vld [vmem:[#allocation11 + $0xb8] sm:$0xff]   ;;  %v2038_v7 = vld [vmem:[#allocation11 + $0xf0] sm:$0xff]  }
 0x15c   :  { %v913_v17 = vadd.f32 %v912_v11, %v911_v4  ;;  %v918_v18 = vrot.slane %v917_v12, 2  ;;  %v929_v23 = vadd.f32 %v928_v20, %v907_v16  ;;  %v924_v37 = vrot.slane %v923_v33, 2  ;;  %v2039_v16 = vld [vmem:[#allocation11 + $0xb0] sm:$0xff]  }
 0x15e   :  { %v914_v21 = vrot.slane %v913_v17, 1  ;;  %v919_v22 = vadd.f32 %v918_v18, %v917_v12  ;;  %v930_v27 = vrot.slane %v929_v23, 2  ;;  %v925_v40 = vadd.f32 %v924_v37, %v923_v33  ;;  %v2044_v33 = vld [vmem:[#allocation11 + $0xd8] sm:$0xff]  }
 0x15f   :  { %v216_v12 = vrot.slane %v2306_v6, %v2366_v62 }
 0x160   :  { %v915_v24 = vadd.f32 %v914_v21, %v913_v17  ;;  %v920_v25 = vrot.slane %v919_v22, 1  ;;  %v931_v30 = vadd.f32 %v930_v27, %v929_v23  ;;  %v926_v42 = vrot.slane %v925_v40, 1  ;;  %v2040_v17 = vld [vmem:[#allocation11 + $0xe8] sm:$0xff]   ;;  %v2042_v27 = vld [vmem:[#allocation11 + $0xe0] sm:$0xff]  }
 0x161   :  { %v2041_v23 = vld [vmem:[#allocation11 + $0xa8] sm:$0xff]  }
 0x162   :  { %v946_v28 = vmul.f32 0.5, %v915_v24  ;;  %v921_v29 = vadd.f32 %v920_v25, %v919_v22  ;;  %v932_v34 = vrot.slane %v931_v30, 1  ;;  %v927_v49 = vadd.f32 %v926_v42, %v925_v40 }
 0x164   :  { %v952_v31 = vadd.f32 1e-05, %v946_v28  ;;  %v947_v32 = vmul.f32 0.5, %v921_v29  ;;  %v933_v36 = vadd.f32 %v932_v34, %v931_v30  ;;  %v948_v57 = vmul.f32 0.5, %v927_v49  ;;  %v2043_v30 = vld [vmem:[#allocation11 + $0xa0] sm:$0xff]  }
 0x166   :  { %2068 = vrsqrt.f32 %v952_v31  ;;  %v953_v35 = vadd.f32 1e-05, %v947_v32  ;;  %v949_v38 = vmul.f32 0.5, %v933_v36  ;;  %v954_v3 = vadd.f32 1e-05, %v948_v57  ;;  %v2045_v36 = vld [vmem:[#allocation11 + $0x98] sm:$0xff]  }
 0x168   :  { %2070 = vrsqrt.f32 %v953_v35  ;;  %v955_v39 = vadd.f32 1e-05, %v949_v38 }
 0x16a   :  { %2072 = vrsqrt.f32 %v955_v39  ;;  %v2046_v39 = vld [vmem:[#allocation11 + $0xd0] sm:$0xff]  }
 0x16b   :  { %2074 = vrsqrt.f32 %v954_v3 }
 0x173   :  { %v2069_v45 = vpop.eup %2068 }
 0x174   :  { %v964_v46 = vmul.f32 %v2069_v45, %v892_v53  ;;  %v987_v53 = vrot.slane %v2345_v41, %v2320_v13  ;;  %v2047_v45 = vld [vmem:[#allocation11 + $0x90] sm:$0xff]  }
 0x175   :  { %v2071_v48 = vpop.eup %2070 }
 0x176   :  { %v1002_v51 = vmul.f32 %v975_v43, %v964_v46  ;;  %v965_v52 = vmul.f32 %v2071_v48, %v893_v58  ;;  %v1025_v58 = vrot.slane %v2352_v44, %v2320_v13 }
 0x177   :  { %v2073_v60 = vpop.eup %2072 }
 0x178   :  { %v1003_v55 = vmul.f32 %v979_v47, %v965_v52  ;;  %v1040_v59 = vadd.f32 %v1013_v50, %v1002_v51  ;;  %v967_v5 = vmul.f32 %v2073_v60, %v895_v9  ;;  %v2075_v40 = vpop.eup %2074  ;;  %v983_v47 = vrot.slane %v2345_v41, %v2314_v10  ;;  %v2048_v50 = vld [vmem:[#allocation11 + $0xc8] sm:$0xff]  }
 0x179   :  { %v966_v46 = vmul.f32 %v2075_v40, %v2338_v2  ;;  %v2050_v2 = vld [vmem:[#allocation11 + $0xc0] sm:$0xff]  }
 0x17a   :  { %v1041_v61 = vadd.f32 %v1017_v54, %v1003_v55  ;;  %v1791_v4 = vpack.c.bf16 %v1040_v59, %v1040_v59  ;;  %v1005_v11 = vmul.f32 %v987_v53, %v967_v5  ;;  %v2049_v55 = vld [vmem:[#allocation11 + $0x88] sm:$0xff]   ;;  %v1021_v53 = vrot.slane %v2352_v44, %v2314_v10 }
 0x17b   :  { %v1004_v57 = vmul.f32 %v983_v47, %v966_v46 }
 0x17c   :  { %v1792_v63 = vpack.c.bf16 %v1041_v61, %v1041_v61  ;;  %v1043_v15 = vadd.f32 %v1025_v58, %v1005_v11 }
 0x17e   :  { %1513 = vmatprep.mubr.bf16.mxu1 %v1792_v63  ;;  %v1794_v18 = vpack.c.bf16 %v1043_v15, %v1043_v15  ;;  %v2051_v63 = vld [vmem:[#allocation11 + $0x80] sm:$0xff]  }
 0x17f   :  { %v826_v14 = vpop.f32.mrf.mxu0  ;;  %1514 = vmatmul.mubr.bf16.vlgmr.msra.gmra.mxu1 %v1791_v4 }
 0x180   :  { %v827_v9 = vadd.f32 %v826_v14, %v212_v8  ;;  %1820 = vmatpush3.bf16.msra.mxu1 %v2037_v0  ;;  %1553 = vmatprep.mubr.bf16.mxu1 %v1794_v18  ;;  %v1042_v8 = vadd.f32 %v1021_v53, %v1004_v57  ;;  %v991_v18 = vrot.slane %v2345_v41, %v2361_v56 }
 0x181   :  { %v828_v13 = vpop.f32.mrf.mxu0  ;;  %1821 = vmatprep.subr.bf16.mxu1 %v2038_v7 }
 0x182   :  { %837 = vst [vmem:[#allocation13 + $0x20] sm:$0xff] %v827_v9  ;;  %v848_v19 = vsel %vm841_vm0, %v827_v9, 0.0  ;;  %v829_v20 = vadd.f32 %v828_v13, %v216_v12  ;;  %v1793_v1 = vpack.c.bf16 %v1042_v8, %v1042_v8 }
 0x183   :  { %v874_v21 = vrot.slane %v848_v19, 4  ;;  %v830_v22 = vpop.f32.mrf.mxu0 }
 0x184   :  { %838 = vst [vmem:[#allocation13 + $0x28] sm:$0xff] %v829_v20  ;;  %v849_v6 = vsel %vm841_vm0, %v829_v20, 0.0  ;;  %1822 = vmatpush3.bf16.msra.mxu1 %v2039_v16 }
 0x185   :  { %v875_v24 = vadd.f32 %v874_v21, %v848_v19  ;;  %v880_v25 = vrot.slane %v849_v6, 4  ;;  %v831_v26 = vpop.f32.mrf.mxu0  ;;  %1823 = vmatprep.subr.bf16.mxu1 %v2040_v17  ;;  %v995_v21 = vrot.slane %v2345_v41, %v2366_v62 }
 0x187   :  { %v876_v28 = vrot.slane %v875_v24, 2  ;;  %v881_v29 = vadd.f32 %v880_v25, %v849_v6  ;;  %v1029_v6 = vrot.slane %v2352_v44, %v2361_v56  ;;  %v1033_v25 = vrot.slane %v2352_v44, %v2366_v62 }
 0x188   :  { %1824 = vmatpush3.bf16.msra.mxu1 %v2041_v23 }
 0x189   :  { %v877_v31 = vadd.f32 %v876_v28, %v875_v24  ;;  %v882_v32 = vrot.slane %v881_v29, 2  ;;  %1825 = vmatprep.subr.bf16.mxu1 %v2042_v27 }
 0x18b   :  { %v878_v34 = vrot.slane %v877_v31, 1  ;;  %v883_v35 = vadd.f32 %v882_v32, %v881_v29 }
 0x18c   :  { %1826 = vmatpush3.bf16.msra.mxu1 %v2043_v30 }
 0x18d   :  { %v879_v37 = vadd.f32 %v878_v34, %v877_v31  ;;  %v884_v38 = vrot.slane %v883_v35, 1  ;;  %1827 = vmatprep.subr.bf16.mxu1 %v2044_v33 }
 0x18f   :  { %v890_v42 = vmul.f32 0.5, %v879_v37  ;;  %v885_v43 = vadd.f32 %v884_v38, %v883_v35 }
 0x190   :  { %1828 = vmatpush3.bf16.msra.mxu1 %v2045_v36 }
 0x191   :  { %v896_v48 = vsub.f32 %v827_v9, %v890_v42  ;;  %v891_v49 = vmul.f32 0.5, %v885_v43  ;;  %1829 = vmatprep.subr.bf16.mxu1 %v2046_v39 }
 0x193   :  { %v902_v51 = vsel %vm841_vm0, %v896_v48, 0.0  ;;  %v897_v52 = vsub.f32 %v829_v20, %v891_v49 }
 0x194   :  { %v908_v54 = vmul.f32 %v902_v51, %v902_v51  ;;  %1830 = vmatpush3.bf16.msra.mxu1 %v2047_v45 }
 0x195   :  { %v903_v59 = vsel %vm841_vm0, %v897_v52, 0.0  ;;  %1831 = vmatprep.subr.bf16.mxu1 %v2048_v50 }
 0x196   :  { %v934_v60 = vrot.slane %v908_v54, 4  ;;  %v909_v61 = vmul.f32 %v903_v59, %v903_v59 }
 0x198   :  { %v935_v5 = vadd.f32 %v934_v60, %v908_v54  ;;  %v940_v58 = vrot.slane %v909_v61, 4  ;;  %1832 = vmatpush3.bf16.msra.mxu1 %v2049_v55 }
 0x199   :  { %1833 = vmatprep.subr.bf16.mxu1 %v2050_v2 }
 0x19a   :  { %v936_v0 = vrot.slane %v935_v5, 2  ;;  %v941_v3 = vadd.f32 %v940_v58, %v909_v61 }
 0x19c   :  { %v937_v4 = vadd.f32 %v936_v0, %v935_v5  ;;  %v942_v7 = vrot.slane %v941_v3, 2  ;;  %1834 = vmatpush3.bf16.msra.mxu1 %v2051_v63 }
 0x19e   :  { %v938_v11 = vrot.slane %v937_v4, 1  ;;  %v943_v12 = vadd.f32 %v942_v7, %v941_v3 }
 0x19f   :  { %1554 = vmatmul.mubr.bf16.vlgmr.msra.gmra.mxu1 %v1793_v1 }
 0x1a0   :  { %v939_v14 = vadd.f32 %v938_v11, %v937_v4  ;;  %v944_v15 = vrot.slane %v943_v12, 1 }
 0x1a2   :  { %v950_v10 = vmul.f32 0.5, %v939_v14  ;;  %v945_v9 = vadd.f32 %v944_v15, %v943_v12 }
 0x1a4   :  { %v956_v16 = vadd.f32 1e-05, %v950_v10  ;;  %v951_v13 = vmul.f32 0.5, %v945_v9 }
 0x1a6   :  { %2076 = vrsqrt.f32 %v956_v16  ;;  %v957_v17 = vadd.f32 1e-05, %v951_v13 }
 0x1a8   :  { %2078 = vrsqrt.f32 %v957_v17 }
 0x1b3   :  { %v2077_v19 = vpop.eup %2076 }
 0x1b4   :  { %v968_v20 = vmul.f32 %v2077_v19, %v896_v48 }
 0x1b5   :  { %v2079_v22 = vpop.eup %2078 }
 0x1b6   :  { %v1006_v23 = vmul.f32 %v991_v18, %v968_v20  ;;  %v969_v24 = vmul.f32 %v2079_v22, %v897_v52 }
 0x1b8   :  { %v1007_v26 = vmul.f32 %v995_v21, %v969_v24  ;;  %v1044_v27 = vadd.f32 %v1029_v6, %v1006_v23 }
 0x1ba   :  { %v1045_v28 = vadd.f32 %v1033_v25, %v1007_v26  ;;  %v1795_v30 = vpack.c.bf16 %v1044_v27, %v1044_v27 }
 0x1bc   :  { %v1796_v29 = vpack.c.bf16 %v1045_v28, %v1045_v28 }
 0x1be   :  { %1593 = vmatprep.mubr.bf16.mxu0 %v1796_v29 }
 0x1bf   :  { %1594 = vmatmul.mubr.bf16.vlgmr.msra.gmra.mxu0 %v1795_v30 }
 0x1c0   :  { %2191 = shalt.err (!%p2188_p1)
}
 0x1c1   :  { %1621 = dma.vmem_to_hbm [thread:$0]  %s1619_s27, 768, %s2408_s7, [#allocation14]  }
 0x1c2   :  { %s2240_s8 = smov [#allocation12]  }
 0x1c3   :  { %s1608_s9 = sshll.u32 %s2240_s8, 4  ;;  %s1609_s9 = int_to_ptr.vmem [resolvable:$true] %s1608_s9 }
 0x1c4   :  { %s2200_s7 = scalar_lea.vmem %s1609_s9, 128  ;;  %p2205_p3 = scmp.lt.s32.totalorder %s1609_s9, %s1609_s9 }
 0x1c5   :  { %p2201_p2 = scmp.ne.s32.totalorder %s1609_s9, %s2200_s7  ;;  %p2206_p4 = scmp.lt.s32.totalorder %s2200_s7, %s2200_s7 }
 0x1c7   :  { %p2207_p5 = por %p2206_p4, %p2205_p3 }
 0x1c9   :  { %p2208_p6 = pnand %p2207_p5, %p2201_p2 }
 0x23f   :  { %v1813_v41 = vpop.f32.mrf.mxu1 }
 0x241   :  { %v1814_v44 = vpop.f32.mrf.mxu1 }
 0x242   :  { %v1815_v37 = vadd.f32 %v1814_v44, %v1813_v41 }
 0x243   :  { %v1816_v56 = vpop.f32.mrf.mxu1 }
 0x245   :  { %v1817_v62 = vpop.f32.mrf.mxu1 }
 0x25f   :  { %v1835_v31 = vpop.f32.mrf.mxu1 }
 0x261   :  { %v1836_v32 = vpop.f32.mrf.mxu1 }
 0x262   :  { %v1837_v35 = vadd.f32 %v1836_v32, %v1835_v31 }
 0x263   :  { %v1838_v33 = vpop.f32.mrf.mxu1 }
 0x264   :  { %v1556_v39 = vadd.f32 %v1837_v35, %v1815_v37 }
 0x265   :  { %v1839_v34 = vpop.f32.mrf.mxu1 }
 0x27f   :  { %v1857_v36 = vpop.f32.mrf.mxu0 }
 0x281   :  { %v1858_v38 = vpop.f32.mrf.mxu0 }
 0x282   :  { %v1859_v40 = vadd.f32 %v1858_v38, %v1857_v36 }
 0x283   :  { %v1860_v42 = vpop.f32.mrf.mxu0 }
 0x284   :  { %v1596_v43 = vadd.f32 %v1859_v40, %v1556_v39 }
 0x285   :  { %v1861_v45 = vpop.f32.mrf.mxu0 }
 0x286   :  { %1601 = vst [vmem:[#allocation12] sm:$0xff] %v1596_v43 }
 0x287   :  { %2211 = shalt.err (!%p2208_p6)
}
 0x288   :  { %1611 = dma.vmem_to_hbm [thread:$0]  %s1609_s9, 128, %s2407_s6, [#allocation5]  }
 0x289   :  { %2226 = dma.done.wait [#allocation5], 128  }
 0x28a   :  { %2227 = vsyncadd [#allocation5], 4294967168 }
 0x28b   :  { %2228 = dma.done.wait [#allocation14], 768  }
 0x28c   :  { %2229 = vsyncadd [#allocation14], 4294966528 }
 0x28d   :  { %1628 = vsyncpa [#allocation4], 1 }
 0x28e   :  { %1629 = vsyncpa [#allocation7], 1 }
 0x28f   :  { %1630 = vsyncpa [#allocation10], 1 }
 0x290   :  { %1631 = vsyncpa [#allocation5], 1 }
 0x291   :  { %1632 = vsyncpa [#allocation14], 1 }

</bundles_post_ra>
